<compile_context>
chip_gen: v7x
topology: tpu7x:2x2x1
jax: 0.10.0
libtpu: 0.0.40
codegen_flags: <defaults>
</compile_context>

<pallas_src>
import functools

import jax
import jax.numpy as jnp
from jax.experimental import pallas as pl
from jax.experimental.pallas import tpu as pltpu

EPS = 1e-5
_LANE = 128
_SUBLANE = 8


# ----------------------------- small helpers ------------------------------- #
def _round_up(x, m):
    return ((x + m - 1) // m) * m


def _pad2(a, rows, cols):
    return jnp.pad(a, ((0, rows - a.shape[0]), (0, cols - a.shape[1])))


def _pad1(v, n):
    return jnp.pad(v, (0, n - v.shape[0]))


_VMEM_CAPACITY = None


def _vmem_capacity_bytes():
    """Physical VMEM of this TPU generation (128 MiB v5e/v6e, 64 MiB v7x)."""
    global _VMEM_CAPACITY
    if _VMEM_CAPACITY is None:
        try:
            _VMEM_CAPACITY = int(pltpu.get_tpu_info().vmem_capacity_bytes)
        except Exception:
            _VMEM_CAPACITY = 64 << 20  # conservative fallback = v7x per-core VMEM
    return _VMEM_CAPACITY


def _compiler_params(dim_sem, est_vmem_bytes):
    cap = _vmem_capacity_bytes()
    # Leave 8 MiB of headroom for Mosaic internal scratch (important on v7x's 64 MiB).
    limit = int(max(32 << 20, min(int(est_vmem_bytes) + (16 << 20), cap - (8 << 20))))
    return pltpu.CompilerParams(dimension_semantics=dim_sem, vmem_limit_bytes=limit)


# ----------------------------- fused whole-network kernel ------------------ #
def _fused_kernel(x_ref, w_ref, bgb_ref, o_ref, *, n_real, n_pad):
    layer = pl.program_id(0)

    # Layer 0: seed the resident activation (the aliased, constant-index output block).
    @pl.when(layer == 0)
    def _():
        o_ref[...] = x_ref[...]

    h = o_ref[...]                                  # bf16 resident activation
    bgb = bgb_ref[0]                                # (3, f_pad): bias, gamma, beta
    y = jnp.dot(h, w_ref[0], preferred_element_type=jnp.float32) + bgb[0:1]

    # Training-mode BatchNorm1d statistics over the *real* rows only.  Masking is
    # only emitted when padded rows exist (trace-time decision).
    inv_n = 1.0 / float(n_real)
    if n_real != n_pad:
        valid = jax.lax.broadcasted_iota(jnp.int32, y.shape, 0) < n_real
        y_stat = jnp.where(valid, y, 0.0)
    else:
        y_stat = y
    mean = jnp.sum(y_stat, axis=0, keepdims=True) * inv_n
    diff = y - mean
    if n_real != n_pad:
        d_stat = jnp.where(valid, diff, 0.0)
    else:
        d_stat = diff
    var = jnp.sum(d_stat * d_stat, axis=0, keepdims=True) * inv_n
    scale = jax.lax.rsqrt(var + EPS) * bgb[1:2]     # rsqrt runs on the EUP slot
    o_ref[...] = jnp.maximum(diff * scale + bgb[2:3], 0.0).astype(o_ref.dtype)


def _fused_forward(x, prep):
    n = x.shape[0]
    f_pad = prep["f_pad"]
    n_layers = prep["num_layers"]
    mm_dtype = prep["mm_dtype"]
    item = jnp.dtype(mm_dtype).itemsize
    n_pad = _round_up(max(n, _SUBLANE), _SUBLANE)

    x_pad = _pad2(x.astype(jnp.float32), n_pad, f_pad).astype(mm_dtype)
    w_stack, bgb_stack = prep["w_stack"], prep["bgb_stack"]

    act_bytes = n_pad * f_pad * item
    w_blk_bytes = f_pad * f_pad * item
    est_vmem = 4 * act_bytes + 2 * w_blk_bytes + 8 * 3 * f_pad * 4

    cost = pl.CostEstimate(
        flops=int(2 * n_layers * n_pad * f_pad * f_pad + 10 * n_layers * n_pad * f_pad),
        transcendentals=int(n_layers * f_pad),
        bytes_accessed=int(2 * act_bytes
                           + w_stack.size * w_stack.dtype.itemsize
                           + bgb_stack.size * 4))

    kernel = functools.partial(_fused_kernel, n_real=n, n_pad=n_pad)
    out = pl.pallas_call(
        kernel,
        out_shape=jax.ShapeDtypeStruct((n_pad, f_pad), mm_dtype),
        grid_spec=pltpu.PrefetchScalarGridSpec(
            num_scalar_prefetch=0,
            grid=(n_layers,),
            in_specs=[
                pl.BlockSpec((n_pad, f_pad), lambda l: (0, 0)),        # x (fetched once)
                pl.BlockSpec((1, f_pad, f_pad), lambda l: (l, 0, 0)),  # per-layer W
                pl.BlockSpec((1, 3, f_pad), lambda l: (l, 0, 0)),      # bias/gamma/beta
            ],
            out_specs=pl.BlockSpec((n_pad, f_pad), lambda l: (0, 0)),  # resident activation
        ),
        input_output_aliases={0: 0},      # x's HBM buffer doubles as the output buffer
        compiler_params=_compiler_params(("arbitrary",), est_vmem),
        cost_estimate=cost,
    )(x_pad, w_stack, bgb_stack)
    return out[:n, :prep["out_dim"]].astype(jnp.float32)


# ----------------------------- row-tiled per-layer kernels ----------------- #
def _stats_kernel(x_ref, w_ref, s_ref):
    # Per-feature sum / sum-of-squares of x@W (bias-shifted BN statistics).
    # Padded rows of x are zero => they contribute exactly 0; no masking needed.
    @pl.when(pl.program_id(0) == 0)
    def _():
        s_ref[...] = jnp.zeros_like(s_ref)
    y0 = jnp.dot(x_ref[...], w_ref[...], preferred_element_type=jnp.float32)
    s_ref[...] += jnp.concatenate(
        [jnp.sum(y0, axis=0, keepdims=True),
         jnp.sum(y0 * y0, axis=0, keepdims=True)], axis=0)


def _apply_kernel(x_ref, w_ref, gb_ref, s_ref, o_ref, *, n_real, n_pad, tile_n):
    y0 = jnp.dot(x_ref[...], w_ref[...], preferred_element_type=jnp.float32)
    inv_n = 1.0 / float(n_real)
    s = s_ref[...]
    gb = gb_ref[...]
    mean0 = s[0:1] * inv_n                                    # mean of x@W
    var = jnp.maximum(s[1:2] * inv_n - mean0 * mean0, 0.0)    # bias cancels in BN
    scale = jax.lax.rsqrt(var + EPS) * gb[0:1]
    out = jnp.maximum((y0 - mean0) * scale + gb[1:2], 0.0)    # (y - mean) == (x@W - mean0)
    if n_real != n_pad:
        # Keep padded rows exactly zero so the next layer's stats stay mask-free.
        valid = (jax.lax.broadcasted_iota(jnp.int32, out.shape, 0)
                 + pl.program_id(0) * tile_n) < n_real
        out = jnp.where(valid, out, 0.0)
    o_ref[...] = out.astype(o_ref.dtype)


def _tiled_layer(h, w_p, gb_p, *, n_real, tile_n, num_tiles, out_dtype):
    f_in_p, f_out_p = w_p.shape
    n_pad = h.shape[0]
    in_item = h.dtype.itemsize
    out_item = jnp.dtype(out_dtype).itemsize
    w_bytes = f_in_p * f_out_p * w_p.dtype.itemsize

    # Pass A: full-batch statistics (resident accumulator, axis "arbitrary").
    est_stats = 2 * tile_n * f_in_p * in_item + 2 * w_bytes + 8 * f_out_p * 4
    stats = pl.pallas_call(
        _stats_kernel,
        out_shape=jax.ShapeDtypeStruct((2, f_out_p), jnp.float32),
        grid_spec=pltpu.PrefetchScalarGridSpec(
            num_scalar_prefetch=0,
            grid=(num_tiles,),
            in_specs=[pl.BlockSpec((tile_n, f_in_p), lambda i: (i, 0)),
                      pl.BlockSpec((f_in_p, f_out_p), lambda i: (0, 0))],
            out_specs=pl.BlockSpec((2, f_out_p), lambda i: (0, 0)),
        ),
        compiler_params=_compiler_params(("arbitrary",), est_stats),
        cost_estimate=pl.CostEstimate(
            flops=int(2 * n_pad * f_in_p * f_out_p + 4 * n_pad * f_out_p),
            transcendentals=0,
            bytes_accessed=int(n_pad * f_in_p * in_item + w_bytes + 2 * f_out_p * 4)),
    )(h, w_p)

    # Pass B: recompute x@W, normalize + ReLU; row tiles independent => "parallel"
    # (sharded across both TensorCores on v7x).
    est_apply = (2 * tile_n * f_in_p * in_item + 2 * tile_n * f_out_p * out_item
                 + 2 * w_bytes + 32 * f_out_p * 4)
    kernel = functools.partial(_apply_kernel, n_real=n_real, n_pad=n_pad, tile_n=tile_n)
    out = pl.pallas_call(
        kernel,
        out_shape=jax.ShapeDtypeStruct((n_pad, f_out_p), out_dtype),
        grid_spec=pltpu.PrefetchScalarGridSpec(
            num_scalar_prefetch=0,
            grid=(num_tiles,),
            in_specs=[pl.BlockSpec((tile_n, f_in_p), lambda i: (i, 0)),
                      pl.BlockSpec((f_in_p, f_out_p), lambda i: (0, 0)),
                      pl.BlockSpec((2, f_out_p), lambda i: (0, 0)),   # gamma/beta
                      pl.BlockSpec((2, f_out_p), lambda i: (0, 0))],  # stats
            out_specs=pl.BlockSpec((tile_n, f_out_p), lambda i: (i, 0)),
        ),
        compiler_params=_compiler_params(("parallel",), est_apply),
        cost_estimate=pl.CostEstimate(
            flops=int(2 * n_pad * f_in_p * f_out_p + 8 * n_pad * f_out_p),
            transcendentals=int(f_out_p),
            bytes_accessed=int(n_pad * f_in_p * in_item + n_pad * f_out_p * out_item
                               + w_bytes + 4 * f_out_p * 4)),
    )(h, w_p, gb_p, stats)
    return out


def _derive_row_tile(n, layers, mm_dtype, row_tile):
    n8 = _round_up(max(n, _SUBLANE), _SUBLANE)
    if row_tile is None:
        cap = _vmem_capacity_bytes()
        budget = cap // 8                      # ~16 MiB v5e/v6e, ~8 MiB v7x per tile set
        f_in_max = max(l["w"].shape[0] for l in layers)
        f_out_max = max(l["w"].shape[1] for l in layers)
        item = jnp.dtype(mm_dtype).itemsize
        per_row = 2 * f_in_max * item + 2 * f_out_max * 4
        avail = max(budget - 2 * f_in_max * f_out_max * item, 256 * 1024)
        row_tile = max(_SUBLANE, min(4096, avail // per_row))
    row_tile = _round_up(max(int(row_tile), _SUBLANE), _SUBLANE)
    if row_tile >= n8:
        return n8, 1
    num_tiles = -(-n8 // row_tile)
    tile_n = _round_up(-(-n8 // num_tiles), _SUBLANE)   # even tiles, minimal padding waste
    num_tiles = -(-n8 // tile_n)
    return tile_n, num_tiles


def _tiled_forward(x, prep, row_tile):
    n = x.shape[0]
    layers = prep["layers"]
    mm_dtype = prep["mm_dtype"]
    tile_n, num_tiles = _derive_row_tile(n, layers, mm_dtype, row_tile)
    n_pad = tile_n * num_tiles

    h = _pad2(x.astype(jnp.float32), n_pad, layers[0]["w"].shape[0]).astype(mm_dtype)
    for li, layer in enumerate(layers):
        last = li == len(layers) - 1
        # Inter-layer activations stay bf16 (halves HBM traffic); final layer in f32.
        out_dtype = jnp.float32 if last else mm_dtype
        h = _tiled_layer(h, layer["w"], layer["gb"], n_real=n, tile_n=tile_n,
                         num_tiles=num_tiles, out_dtype=out_dtype)
    return h[:n, :prep["out_dim"]]


# ----------------------------- parameters & forward ------------------------ #
def init_apply_node_func_params(key, num_layers, input_dim, hidden_dim, output_dim):
    """ApplyNodeFunc(MLP(...)) params; Linear weights stored pre-transposed [in, out]."""
    if num_layers < 1:
        raise ValueError("number of layers should be positive!")
    if num_layers == 1:
        dims = [(input_dim, output_dim)]
    else:
        dims = ([(input_dim, hidden_dim)]
                + [(hidden_dim, hidden_dim)] * (num_layers - 2)
                + [(hidden_dim, output_dim)])
    linears = []
    for fan_in, fan_out in dims:
        key, kw, kb = jax.random.split(key, 3)
        bound = 1.0 / float(fan_in) ** 0.5
        w = jax.random.uniform(kw, (fan_in, fan_out), jnp.float32, -bound, bound)
        b = jax.random.uniform(kb, (fan_out,), jnp.float32, -bound, bound)
        linears.append((w, b))
    # Every linear is followed by BN + ReLU (MLP-internal BNs + ApplyNodeFunc's BN).
    bns = [(jnp.ones((fo,), jnp.float32), jnp.zeros((fo,), jnp.float32)) for _, fo in dims]
    return {"linears": linears, "bns": bns}


def prepare_apply_node_func_params(params, mm_dtype=jnp.bfloat16):
    """One-time padding / stacking / casting of weights (hoisted out of the forward)."""
    linears, bns = params["linears"], params["bns"]
    in_dims = [w.shape[0] for w, _ in linears]
    out_dims = [w.shape[1] for w, _ in linears]
    f_pad = max(_round_up(d, _LANE) for d in in_dims + out_dims)

    # Fused path: (L, f_pad, f_pad) weight cube + packed (L, 3, f_pad) bias/gamma/beta.
    w_stack = jnp.stack([_pad2(w, f_pad, f_pad) for w, _ in linears]).astype(mm_dtype)
    bgb_stack = jnp.stack([
        jnp.stack([_pad1(b, f_pad), _pad1(g, f_pad), _pad1(be, f_pad)])
        for (_, b), (g, be) in zip(linears, bns)]).astype(jnp.float32)

    # Tiled path: per-layer padding (no global-max padding waste); bias is not needed
    # because training-mode BN after a linear cancels it exactly.
    layers = []
    padded_flops = 0
    for (w, _), (g, be) in zip(linears, bns):
        f_in_p = _round_up(w.shape[0], _LANE)
        f_out_p = _round_up(w.shape[1], _LANE)
        layers.append({
            "w": _pad2(w, f_in_p, f_out_p).astype(mm_dtype),
            "gb": jnp.stack([_pad1(g, f_out_p), _pad1(be, f_out_p)]).astype(jnp.float32),
        })
        padded_flops += f_in_p * f_out_p
    # Only take the fused (global-max padded) path when the extra MXU flops / weight
    # DMA from padding every layer to f_pad x f_pad stay bounded.
    fused_waste_ok = len(linears) * f_pad * f_pad <= 2 * padded_flops

    return {"w_stack": w_stack, "bgb_stack": bgb_stack, "layers": layers,
            "f_pad": f_pad, "num_layers": len(linears), "out_dim": out_dims[-1],
            "mm_dtype": mm_dtype, "fused_waste_ok": fused_waste_ok}


def apply_node_func_forward(params, x, *, mm_dtype=jnp.bfloat16, row_tile=None,
                            force_path=None):
    """out = relu(BatchNorm1d(MLP(x))) with training-mode BatchNorm semantics."""
    prep = params if "w_stack" in params else prepare_apply_node_func_params(params, mm_dtype)

    n = x.shape[0]
    f_pad = prep["f_pad"]
    n_pad = _round_up(max(n, _SUBLANE), _SUBLANE)
    item = jnp.dtype(prep["mm_dtype"]).itemsize
    est_fused = 4 * n_pad * f_pad * item + 2 * f_pad * f_pad * item + (1 << 20)
    use_fused = prep["fused_waste_ok"] and est_fused <= int(0.6 * _vmem_capacity_bytes())
    if force_path == "fused":
        use_fused = True
    elif force_path == "tiled":
        use_fused = False
    if use_fused:
        return _fused_forward(x, prep)
    return _tiled_forward(x, prep, row_tile)


# ----------------------------- pure-JAX reference -------------------------- #
def apply_node_func_reference(params, x, mm_dtype=jnp.float32):
    h = x.astype(jnp.float32)
    for (w, b), (g, be) in zip(params["linears"], params["bns"]):
        y = jnp.dot(h.astype(mm_dtype), w.astype(mm_dtype),
                    preferred_element_type=jnp.float32) + b
        mean = jnp.mean(y, axis=0, keepdims=True)
        var = jnp.mean(jnp.square(y - mean), axis=0, keepdims=True)
        y = (y - mean) * jax.lax.rsqrt(var + EPS) * g + be
        h = jnp.maximum(y, 0.0)
    return h


# ----------------------------- main ----------------------------------------- #
if __name__ == "__main__":
    num_layers = 3
    input_dim = 16
    hidden_dim = 32
    output_dim = 8
    num_nodes = 64

    key = jax.random.PRNGKey(0)
    k_params, k_x = jax.random.split(key)
    params = init_apply_node_func_params(k_params, num_layers, input_dim, hidden_dim, output_dim)
    x = jax.random.normal(k_x, (num_nodes, input_dim), jnp.float32)

    # Hoisted, one-time weight preparation (padding / packing / bf16 cast).
    prepared = prepare_apply_node_func_params(params, mm_dtype=jnp.bfloat16)

    # Auto path (picks fused here), plus both paths forced for cross-validation.
    out_auto = jax.block_until_ready(apply_node_func_forward(prepared, x))
    out_fused = jax.block_until_ready(
        apply_node_func_forward(prepared, x, force_path="fused"))
    out_tiled = jax.block_until_ready(
        apply_node_func_forward(prepared, x, force_path="tiled", row_tile=16))

    ref = apply_node_func_reference(params, x, mm_dtype=jnp.bfloat16)

    assert out_fused.shape == (num_nodes, output_dim)
    assert out_tiled.shape == (num_nodes, output_dim)
    assert jnp.allclose(out_fused, ref, atol=1e-2, rtol=1e-2), "fused path mismatch vs reference"
    assert jnp.allclose(out_tiled, ref, atol=1e-2, rtol=1e-2), "tiled path mismatch vs reference"
    assert jnp.allclose(out_auto, ref, atol=1e-2, rtol=1e-2), "auto path mismatch vs reference"
    assert jnp.allclose(out_fused, out_tiled, atol=1e-2, rtol=1e-2), "fused vs tiled mismatch"

    print("KERNEL_OK")
</pallas_src>

<mosaic_0001>
module attributes {stable_mosaic.version = 11 : i64} {
  func.func @_fused_kernel(%arg0: i32, %arg1: memref<64x128xbf16, #tpu.memory_space<vmem>>, %arg2: memref<1x128x128xbf16, #tpu.memory_space<vmem>>, %arg3: memref<1x3x128xf32, #tpu.memory_space<vmem>>, %arg4: memref<64x128xbf16, #tpu.memory_space<vmem>>) attributes {dimension_semantics = [#tpu.dimension_semantics<arbitrary>], iteration_bounds = array<i64: 3>, scalar_prefetch = 0 : i64, scratch_operands = 0 : i64, tpu.core_type = #tpu.core_type<tc>, window_params = [{pipeline_mode = #tpu.pipeline_mode<synchronous>, transform_indices = @transform_0, window_bounds = array<i64: 64, 128>}, {transform_indices = @transform_1, window_bounds = array<i64: 1, 128, 128>}, {transform_indices = @transform_2, window_bounds = array<i64: 1, 3, 128>}, {pipeline_mode = #tpu.pipeline_mode<synchronous>, transform_indices = @transform_3, window_bounds = array<i64: 64, 128>}]} {
    %c0_i32 = arith.constant 0 : i32
    %0 = arith.cmpi eq, %arg0, %c0_i32 : i32
    %1 = arith.extui %0 : i1 to i32
    %c0_i32_0 = arith.constant 0 : i32
    %2 = arith.cmpi ne, %1, %c0_i32_0 : i32
    scf.if %2 {
      %c0_16 = arith.constant 0 : index
      %c0_17 = arith.constant 0 : index
      %37 = vector.load %arg1[%c0_16, %c0_17] : memref<64x128xbf16, #tpu.memory_space<vmem>>, vector<64x128xbf16>
      %c0_18 = arith.constant 0 : index
      %c0_19 = arith.constant 0 : index
      %38 = vector.load %arg4[%c0_18, %c0_19] : memref<64x128xbf16, #tpu.memory_space<vmem>>, vector<64x128xbf16>
      tpu.vector_store %arg4[%c0_18, %c0_19], %37 {strides = array<i32>} : memref<64x128xbf16, #tpu.memory_space<vmem>>, vector<64x128xbf16>,
    } else {
    }
    %c0 = arith.constant 0 : index
    %c0_1 = arith.constant 0 : index
    %3 = vector.load %arg4[%c0, %c0_1] : memref<64x128xbf16, #tpu.memory_space<vmem>>, vector<64x128xbf16>
    %c0_2 = arith.constant 0 : index
    %c0_3 = arith.constant 0 : index
    %c0_4 = arith.constant 0 : index
    %4 = vector.load %arg3[%c0_2, %c0_3, %c0_4] : memref<1x3x128xf32, #tpu.memory_space<vmem>>, vector<1x3x128xf32>
    %5 = vector.shape_cast %4 : vector<1x3x128xf32> to vector<3x128xf32>
    %c0_5 = arith.constant 0 : index
    %c0_6 = arith.constant 0 : index
    %c0_7 = arith.constant 0 : index
    %6 = vector.load %arg2[%c0_5, %c0_6, %c0_7] : memref<1x128x128xbf16, #tpu.memory_space<vmem>>, vector<1x128x128xbf16>
    %7 = vector.shape_cast %6 : vector<1x128x128xbf16> to vector<128x128xbf16>
    %cst = arith.constant dense<0.000000e+00> : vector<64x128xf32>
    %8 = tpu.matmul %3, %7, %cst {dimension_numbers = #tpu.dot_dimension_numbers<[1], [0], [0], [1], [0, 0, 1, 1], [], []>} : vector<64x128xbf16>, vector<128x128xbf16>, vector<64x128xf32> -> vector<64x128xf32>
    %9 = vector.extract_strided_slice %5 {offsets = [0, 0], sizes = [1, 128], strides = [1, 1]} : vector<3x128xf32> to vector<1x128xf32>
    %10 = vector.broadcast %9 : vector<1x128xf32> to vector<64x128xf32>
    %11 = arith.addf %8, %10 : vector<64x128xf32>
    %cst_8 = arith.constant dense<0.000000e+00> : vector<128xf32>
    %12 = vector.multi_reduction <add>, %11, %cst_8 [0] : vector<64x128xf32> to vector<128xf32>
    %13 = vector.shape_cast %12 : vector<128xf32> to vector<1x128xf32>
    %cst_9 = arith.constant 1.562500e-02 : f32
    %14 = vector.broadcast %cst_9 : f32 to vector<1x128xf32>
    %15 = arith.mulf %13, %14 : vector<1x128xf32>
    %16 = vector.broadcast %15 : vector<1x128xf32> to vector<64x128xf32>
    %17 = arith.subf %11, %16 : vector<64x128xf32>
    %18 = arith.mulf %17, %17 : vector<64x128xf32>
    %cst_10 = arith.constant dense<0.000000e+00> : vector<128xf32>
    %19 = vector.multi_reduction <add>, %18, %cst_10 [0] : vector<64x128xf32> to vector<128xf32>
    %20 = vector.shape_cast %19 : vector<128xf32> to vector<1x128xf32>
    %cst_11 = arith.constant 1.562500e-02 : f32
    %21 = vector.broadcast %cst_11 : f32 to vector<1x128xf32>
    %22 = arith.mulf %20, %21 : vector<1x128xf32>
    %cst_12 = arith.constant 9.99999974E-6 : f32
    %23 = vector.broadcast %cst_12 : f32 to vector<1x128xf32>
    %24 = arith.addf %22, %23 : vector<1x128xf32>
    %25 = math.rsqrt %24 : vector<1x128xf32>
    %26 = vector.extract_strided_slice %5 {offsets = [1, 0], sizes = [1, 128], strides = [1, 1]} : vector<3x128xf32> to vector<1x128xf32>
    %27 = arith.mulf %25, %26 : vector<1x128xf32>
    %28 = vector.broadcast %27 : vector<1x128xf32> to vector<64x128xf32>
    %29 = arith.mulf %17, %28 : vector<64x128xf32>
    %30 = vector.extract_strided_slice %5 {offsets = [2, 0], sizes = [1, 128], strides = [1, 1]} : vector<3x128xf32> to vector<1x128xf32>
    %31 = vector.broadcast %30 : vector<1x128xf32> to vector<64x128xf32>
    %32 = arith.addf %29, %31 : vector<64x128xf32>
    %cst_13 = arith.constant 0.000000e+00 : f32
    %33 = vector.broadcast %cst_13 : f32 to vector<64x128xf32>
    %34 = arith.maximumf %32, %33 : vector<64x128xf32>
    %35 = arith.truncf %34 : vector<64x128xf32> to vector<64x128xbf16>
    %c0_14 = arith.constant 0 : index
    %c0_15 = arith.constant 0 : index
    %36 = vector.load %arg4[%c0_14, %c0_15] : memref<64x128xbf16, #tpu.memory_space<vmem>>, vector<64x128xbf16>
    tpu.vector_store %arg4[%c0_14, %c0_15], %35 {strides = array<i32>} : memref<64x128xbf16, #tpu.memory_space<vmem>>, vector<64x128xbf16>,
    return
  }
  func.func @transform_0(%arg0: i32) -> (i32, i32) {
    %c0_i32 = arith.constant 0 : i32
    %c0_i32_0 = arith.constant 0 : i32
    %c0_i32_1 = arith.constant 0 : i32
    return %c0_i32, %c0_i32_0 : i32, i32
  }
  func.func @transform_1(%arg0: i32) -> (i32, i32, i32) {
    %c0_i32 = arith.constant 0 : i32
    %c0_i32_0 = arith.constant 0 : i32
    %c0_i32_1 = arith.constant 0 : i32
    return %arg0, %c0_i32, %c0_i32_0 : i32, i32, i32
  }
  func.func @transform_2(%arg0: i32) -> (i32, i32, i32) {
    %c0_i32 = arith.constant 0 : i32
    %c0_i32_0 = arith.constant 0 : i32
    %c0_i32_1 = arith.constant 0 : i32
    return %arg0, %c0_i32, %c0_i32_0 : i32, i32, i32
  }
  func.func @transform_3(%arg0: i32) -> (i32, i32) {
    %c0_i32 = arith.constant 0 : i32
    %c0_i32_0 = arith.constant 0 : i32
    %c0_i32_1 = arith.constant 0 : i32
    return %c0_i32, %c0_i32_0 : i32, i32
  }
}

</mosaic_0001>

<bundles_post_ra>
// kernel: tpu_custom_call.1
= control target key start
LH: loop header
LB: loop body
LE: loop exit
PB: predicated region body
PF: predicated region fallthrough
CT: control target
= control target key end

     0   :  { %8 = vsyncpa [#allocation3], 0  ;;  %s1145_s0 = inlined_call_operand.hbm [shape: bf16[64,128], index: 0, kind: input, shape index: {}, may-alias: {0,3}]   ;;  %s1146_s1 = inlined_call_operand.hbm [shape: bf16[3,128,128], index: 1, kind: input, shape index: {}]   ;;  %s1147_s2 = inlined_call_operand.vmem [shape: f32[3,3,128], index: 2, kind: input, shape index: {}]   ;;  %s1148_s3 = inlined_call_operand.hbm [shape: bf16[64,128], index: 3, kind: output, shape index: {}, may-alias: {0,3}]  }
   0x1   :  { %9 = vsyncpa [#allocation6], 0 }
   0x2   :  { %11 = vsyncpa [#allocation6 + $0x1], 0 }
   0x3   :  { %12 = vsyncpa [#allocation4], 0  ;;  %s948_s12 = smov 0   ;;  %s950_s13 = smov 0  }
   0x4   :  { %s952_s14 = smov 0   ;;  %s954_s15 = smov 0  }
   0x5 LB: > { %s967_s16 = sadd.s32 4294967295, %s919_s15   ;;  %p59_p0 = scmp.ne.s32.totalorder %s911_s13, %s907_s12  ;;  %s919_s15 = sphi %s954_s15, %s1164_s15   ;;  %s915_s14 = sphi %s952_s14, %s1163_s14   ;;  %s911_s13 = sphi %s950_s13, %s1162_s13   ;;  %s907_s12 = sphi %s948_s12, %s1161_s12  }
   0x6   : > { %p1149_p1 = scmp.eq.s32.totalorder %s967_s16, 0  ;;  %p599_p2 = scmp.ge.s32.totalorder %s919_s15, 1 }
   0x7   : > { %p117_p3 = scmp.lt.s32.totalorder %s919_s15, 4  ;;  %s921_s19 = smov [#allocation2]  }
   0x8   : > { %p976_p5 = por %p1149_p1, %p59_p0  ;;  %s129_s20 = sshll.u32 %s921_s19, 4  ;;  %s130_s20 = int_to_ptr.vmem [resolvable:$true] %s129_s20 }
   0x9   : > { %p980_p6 = pnand %p599_p2, %p117_p3  ;;  %s993_s22 = sadd.s32 1, %s919_s15  }
   0xa   : > { %s1152_s17 = scalar_select %p976_p5, 1, 0 }
   0xb   : > { %s1153_s18 = scalar_select %p980_p6, 1, 0 }
   0xc   : > { %p728_p7 = pneg %p980_p6  ;;  %s46_s23 = sadd.s32 1, %s915_s14 }
   0xd   : > { %s43_s24 = ssub.s32 %s919_s15, %s993_s22  ;;  %s793_s27 = scalar_lea.hbm %s1145_s0, 512 }
   0xe   : > { %p988_p8 = pnand %p728_p7, %p1149_p1  ;;  %p794_p9 = scmp.ne.s32.totalorder %s1145_s0, %s793_s27 }
   0xf   : > { %p800_p13 = scmp.lt.u32.totalorder %s793_s27, %s1145_s0 }
  0x10   : > { %p795_p10 = pneg %p988_p8 }
  0x12   : > { %p796_p11 = pnand %p795_p10, %p794_p9 }
  0x14   : > { %p797_p12 = pneg %p796_p11 }
  0x16   : > { %p802_p0 = pnand %p800_p13, %p797_p12 }
  0x18   : > { %805 = shalt.err (!%p802_p0)
}
  0x19   : > { %s806_s5 = scalar_lea.vmem %s130_s20, 512  ;;  %p814_p4 = scmp.lt.s32.totalorder %s130_s20, %s130_s20 }
  0x1a   : > { %p807_p2 = scmp.ne.s32.totalorder %s130_s20, %s806_s5  ;;  %p815_p1 = scmp.lt.s32.totalorder %s806_s5, %s806_s5 }
  0x1c   : > { %p809_p3 = pnand %p807_p2, %p795_p10  ;;  %p816_p5 = por %p815_p1, %p814_p4 }
  0x1e   : > { %p810_p7 = pneg %p809_p3 }
  0x20   : > { %p817_p6 = pnand %p816_p5, %p810_p7 }
  0x22   : > { %820 = shalt.err (!%p817_p6)
}
  0x23   : > { %s922_s6 = smov 64   ;;  %s923_s7 = smov 4  }
  0x24   : > { %731 = dma.hbm_to_vmem [thread:$0]  (!%p988_p8), %s1145_s0, 512, %s130_s20, [#allocation3], %s922_s6, %s922_s6, %s923_s7  }
  0x25   : > { %p44_p1 = scmp.eq.s32.totalorder %s43_s24, 0  ;;  %p53_p4 = scmp.ne.s32.totalorder %s915_s14, %s911_s13 }
  0x26   : > { %p54_p5 = scmp.eq.s32.totalorder %s919_s15, 0  ;;  %p737_p6 = scmp.lt.s32.totalorder %s919_s15, 3 }
  0x27   : > { %s1022_s10 = scalar_select %p44_p1, %s915_s14, %s46_s23  }
  0x28   : > { %p55_p9 = por %p54_p5, %p53_p4  ;;  %s143_s11 = sand.u32 1, %s915_s14  }
  0x29   : > { %s602_s12 = sshll.u32 %s143_s11, 6  ;;  %s634_s19 = sshll.u32 %s919_s15, 10 }
  0x2a   : > { %s1029_s21 = scalar_lea.hbm %s1146_s1, %s634_s19  ;;  %s147_s20 = scalar_lea.vmem [#allocation5], %s602_s12 }
  0x2b   : > { %s154_s24 = sshll.u32 %s147_s20, 4  ;;  %p1033_p8 = pnand %p737_p6, %p55_p9  ;;  %s1031_s24 = int_to_ptr.vmem [resolvable:$true] %s154_s24 }
  0x2c   : > { %s1037_s15 = scalar_lea.sflag [#allocation6], %s143_s11  ;;  %s821_s27 = scalar_lea.hbm %s1029_s21, 1024 }
  0x2d   : > { %p822_p10 = scmp.ne.s32.totalorder %s1029_s21, %s821_s27  ;;  %p823_p11 = pneg %p1033_p8 }
  0x2e   : > { %s826_s30 = scalar_lea.hbm %s1146_s1, 3072  ;;  %p827_p0 = scmp.lt.u32.totalorder %s1029_s21, %s1146_s1 }
  0x2f   : > { %p824_p12 = pnand %p823_p11, %p822_p10  ;;  %p828_p2 = scmp.lt.u32.totalorder %s826_s30, %s821_s27 }
  0x30   : > { %p830_p7 = scmp.lt.u32.totalorder %s821_s27, %s1029_s21 }
  0x31   : > { %p825_p13 = pneg %p824_p12  ;;  %p829_p3 = por %p828_p2, %p827_p0 }
  0x33   : > { %p831_p1 = por %p830_p7, %p829_p3 }
  0x35   : > { %p832_p4 = pnand %p831_p1, %p825_p13 }
  0x37   : > { %835 = shalt.err (!%p832_p4)
}
  0x38   : > { %s836_s8 = scalar_lea.vmem %s1031_s24, 1024  ;;  %s924_s9 = smov [#allocation5]  }
  0x39   : > { %p837_p5 = scmp.ne.s32.totalorder %s1031_s24, %s836_s8  ;;  %s841_s11 = sshll.u32 %s924_s9, 4  ;;  %s842_s11 = int_to_ptr.vmem [resolvable:$false] %s841_s11 }
  0x3a   : > { %s843_s12 = scalar_lea.vmem %s842_s11, 2048  ;;  %p844_p10 = scmp.lt.s32.totalorder %s1031_s24, %s842_s11 }
  0x3b   : > { %p839_p6 = pnand %p837_p5, %p823_p11  ;;  %p845_p12 = scmp.lt.s32.totalorder %s843_s12, %s836_s8 }
  0x3d   : > { %p840_p9 = pneg %p839_p6  ;;  %p846_p0 = por %p845_p12, %p844_p10 }
  0x3f   : > { %p847_p2 = pnand %p846_p0, %p840_p9 }
  0x41   : > { %850 = shalt.err (!%p847_p2)
}
  0x42   : > { %735 = dma.hbm_to_vmem [thread:$0]  (!%p1033_p8), %s1029_s21, 1024, %s1031_s24, %s1037_s15, %s922_s6, %s922_s6, %s923_s7  }
  0x43   : > { %p1156_p11 = scmp.ne.s32.totalorder %s1153_s18, 0 }
  0x44   : > { %p1157_p13 = scmp.eq.s32.totalorder (!%p1156_p11), %s967_s16, 0 }
  0x45   : > { %173 = sbr.rel (%p1156_p11) target bundleno = 443 (0x1bb), region = 32 }
  0x4c   : > { %894 = dma.done.wait (%p1157_p13), [#allocation3], 512   ;;  %p1158_p3 = pmov %p1157_p13 }
  0x4d   : > { %s179_s19 = sand.u32 1, %s911_s13   ;;  %p1159_p7 = scmp.ne.s32.totalorder %s1152_s17, 0 }
  0x4e   : > { %896 = vsyncadd (%p1158_p3), [#allocation3], 4294966784  ;;  %s607_s25 = sshll.u32 %s179_s19, 6  ;;  %s180_s26 = scalar_lea.sflag [#allocation6], %s179_s19 }
  0x4f   : > { %s1075_s20 = scalar_lea.vmem [#allocation5], %s607_s25 }
  0x50   : > { %898 = dma.done.wait (%p1159_p7), %s180_s26, 1024  }
  0x51   : > { %900 = vsyncadd (%p1159_p7), %s180_s26, 4294966272  ;;  %p205_p8 = scmp.lt.s32.totalorder %s967_s16, 2  ;;  %p1160_p1 = scmp.ne.s32.totalorder %s967_s16, 0 }
  0x52   : > { %v214_v0 = vld [vmem:[#allocation2] sm:$0xff] (!%p1160_p1)   ;;  %v216_v1 = vld [vmem:[#allocation2 + $0x8] sm:$0xff] (!%p1160_p1)   ;;  %v218_v2 = vld [vmem:[#allocation2 + $0x10] sm:$0xff] (!%p1160_p1)  }
  0x53   : > { %s206_s18 = scalar_select %p205_p8, %s967_s16, 2 }
  0x54   : > { %213 = sbr.rel (%p1160_p1) target bundleno = 91 (0x5b), region = 44  ;;  %222 = vst [vmem:[#allocation7] sm:$0xff] (!%p1160_p1), %v214_v0   ;;  %224 = vst [vmem:[#allocation7 + $0x8] sm:$0xff] (!%p1160_p1), %v216_v1   ;;  %v220_v3 = vld [vmem:[#allocation2 + $0x18] sm:$0xff] (!%p1160_p1)  }
  0x55   : > { %s608_s6 = sshll.u32 %s206_s18, 2  ;;  %226 = vst [vmem:[#allocation7 + $0x10] sm:$0xff] (!%p1160_p1), %v218_v2   ;;  %228 = vst [vmem:[#allocation7 + $0x18] sm:$0xff] (!%p1160_p1), %v220_v3  }
  0x56   : > { %s1086_s24 = scalar_lea.vmem %s1147_s2, %s608_s6 }
  0x5b PF: > { %v779_v4 = vld [vmem:[%s1075_s20] sm:$0xff]   ;;  %v780_v5 = vld [vmem:[%s1075_s20 + $0x8] sm:$0xff]   ;;  %v781_v6 = vld [vmem:[%s1075_s20 + $0x10] sm:$0xff]   ;;  %v255_v16 = vlaneseq  ;;  %s925_s17 = smov [#allocation7]   ;;  %p739_p4 = scmp.eq.s32.totalorder %s967_s16, 2 }
  0x5c   : > { %678 = vmatprep.subr.bf16.mxu0 %v779_v4  ;;  %702 = vmatprep.subr.bf16.mxu1 %v779_v4  ;;  %v782_v7 = vld [vmem:[%s1075_s20 + $0x18] sm:$0xff]   ;;  %v787_v8 = vld [vmem:[#allocation7] sm:$0xff]   ;;  %v789_v9 = vld [vmem:[#allocation7 + $0x10] sm:$0xff]   ;;  %s521_s23 = sshll.u32 %s925_s17, 4  ;;  %s522_s23 = int_to_ptr.vmem [resolvable:$true] %s521_s23 }
  0x5d   : > { %679 = vmatpush3.bf16.msra.mxu0 %v779_v4  ;;  %710 = vmatpush3.bf16.msra.mxu1 %v779_v4  ;;  %v783_v10 = vld [vmem:[%s1075_s20 + $0x20] sm:$0xff]   ;;  %v784_v11 = vld [vmem:[%s1075_s20 + $0x28] sm:$0xff]   ;;  %v785_v12 = vld [vmem:[%s1075_s20 + $0x30] sm:$0xff]   ;;  %v1098_v17 = vshrl.u32 %v255_v16, 7  ;;  %s851_s15 = scalar_lea.vmem %s522_s23, 512  ;;  %p858_p10 = scmp.lt.s32.totalorder %s522_s23, %s522_s23 }
  0x5e   : > { %680 = vmatprep.subr.bf16.mxu0 %v780_v5  ;;  %703 = vmatprep.subr.bf16.mxu1 %v780_v5  ;;  %v786_v13 = vld [vmem:[%s1075_s20 + $0x38] sm:$0xff]   ;;  %v788_v14 = vld [vmem:[#allocation7 + $0x8] sm:$0xff]   ;;  %v1102_v19 = vld [vmem:[%s1086_s24] sm:$0x7]  ;;  %p852_p5 = scmp.ne.s32.totalorder %s522_s23, %s851_s15  ;;  %p859_p12 = scmp.lt.s32.totalorder %s851_s15, %s851_s15 }
  0x5f   : > { %694 = vmatprep.mubr.bf16.mxu0 %v787_v8  ;;  %698 = vmatprep.mubr.bf16.mxu1 %v789_v9  ;;  %v790_v15 = vld [vmem:[#allocation7 + $0x18] sm:$0xff]   ;;  %v257_v18 = vsub.s32 0, %v1098_v17 }
  0x60   : > { %p853_p6 = pnand %p852_p5, %p739_p4  ;;  %p860_p0 = por %p859_p12, %p858_p10 }
  0x61   : > { %681 = vmatpush3.bf16.msra.mxu0 %v780_v5  ;;  %711 = vmatpush3.bf16.msra.mxu1 %v780_v5  ;;  %v258_v20 = vrot.slane %v1102_v19, %v257_v18 }
  0x62   : > { %682 = vmatprep.subr.bf16.mxu0 %v781_v6  ;;  %704 = vmatprep.subr.bf16.mxu1 %v781_v6  ;;  %p854_p9 = pneg %p853_p6 }
  0x64   : > { %p861_p2 = pnand %p860_p0, %p854_p9 }
  0x65   : > { %683 = vmatpush3.bf16.msra.mxu0 %v781_v6  ;;  %712 = vmatpush3.bf16.msra.mxu1 %v781_v6 }
  0x66   : > { %684 = vmatprep.subr.bf16.mxu0 %v782_v7  ;;  %705 = vmatprep.subr.bf16.mxu1 %v782_v7 }
  0x69   : > { %685 = vmatpush3.bf16.msra.mxu0 %v782_v7  ;;  %713 = vmatpush3.bf16.msra.mxu1 %v782_v7 }
  0x6a   : > { %686 = vmatprep.subr.bf16.mxu0 %v783_v10  ;;  %706 = vmatprep.subr.bf16.mxu1 %v783_v10 }
  0x6d   : > { %687 = vmatpush3.bf16.msra.mxu0 %v783_v10  ;;  %714 = vmatpush3.bf16.msra.mxu1 %v783_v10 }
  0x6e   : > { %688 = vmatprep.subr.bf16.mxu0 %v784_v11  ;;  %707 = vmatprep.subr.bf16.mxu1 %v784_v11 }
  0x71   : > { %689 = vmatpush3.bf16.msra.mxu0 %v784_v11  ;;  %715 = vmatpush3.bf16.msra.mxu1 %v784_v11 }
  0x72   : > { %690 = vmatprep.subr.bf16.mxu0 %v785_v12  ;;  %708 = vmatprep.subr.bf16.mxu1 %v785_v12 }
  0x75   : > { %691 = vmatpush3.bf16.msra.mxu0 %v785_v12  ;;  %716 = vmatpush3.bf16.msra.mxu1 %v785_v12 }
  0x76   : > { %692 = vmatprep.subr.bf16.mxu0 %v786_v13  ;;  %709 = vmatprep.subr.bf16.mxu1 %v786_v13 }
  0x79   : > { %693 = vmatpush3.bf16.msra.mxu0 %v786_v13  ;;  %717 = vmatpush3.bf16.msra.mxu1 %v786_v13 }
  0x7c   : > { %695 = vmatmul.mubr.bf16.vlgmr.msra.gmra.mrb[0].mxu0 %v788_v14  ;;  %699 = vmatmul.mubr.bf16.vlgmr.msra.gmra.mrb[0].mxu1 %v790_v15 }
 0x14f   : > { %v696_v21 = vpop.f32.mrb[0].mxu0  ;;  %v700_v22 = vpop.f32.mrb[0].mxu1 }
 0x150   : > { %v365_v23 = vpop.f32.mrb[1].mxu0  ;;  %v381_v24 = vpop.f32.mrb[1].mxu1  ;;  %v374_v31 = vadd.f32 %v696_v21, %v258_v20  ;;  %v390_v39 = vadd.f32 %v700_v22, %v258_v20  ;;  %v445_v21 = vsub.s32 1, %v1098_v17 }
 0x151   : > { %v697_v25 = vpop.f32.mrb[2].mxu0  ;;  %v701_v26 = vpop.f32.mrb[2].mxu1  ;;  %v366_v29 = vadd.f32 %v365_v23, %v258_v20  ;;  %v382_v35 = vadd.f32 %v381_v24, %v258_v20 }
 0x152   : > { %v368_v27 = vpop.f32.mrb[3].mxu0  ;;  %v384_v28 = vpop.f32.mrb[3].mxu1  ;;  %v377_v33 = vadd.f32 %v697_v25, %v258_v20  ;;  %v393_v41 = vadd.f32 %v701_v26, %v258_v20 }
 0x153   : > { %v369_v30 = vadd.f32 %v368_v27, %v258_v20  ;;  %v385_v38 = vadd.f32 %v384_v28, %v258_v20  ;;  %v457_v20 = vsub.s32 2, %v1098_v17 }
 0x155   : > { %v396_v32 = vadd.f32 %v369_v30, %v366_v29  ;;  %v458_v24 = vrot.slane %v1102_v19, %v457_v20 }
 0x157   : > { %v397_v34 = vadd.f32 %v396_v32, %v374_v31 }
 0x159   : > { %v398_v36 = vadd.f32 %v397_v34, %v377_v33 }
 0x15b   : > { %v399_v37 = vadd.f32 %v398_v36, %v382_v35 }
 0x15d   : > { %v400_v40 = vadd.f32 %v399_v37, %v385_v38 }
 0x15f   : > { %v401_v42 = vadd.f32 %v400_v40, %v390_v39 }
 0x161   : > { %v402_v43 = vadd.f32 %v401_v42, %v393_v41 }
 0x163   : > { %v403_v44 = vrot.slane %v402_v43, 4 }
 0x165   : > { %v404_v45 = vadd.f32 %v403_v44, %v402_v43 }
 0x167   : > { %v405_v46 = vrot.slane %v404_v45, 2 }
 0x169   : > { %v406_v47 = vadd.f32 %v405_v46, %v404_v45 }
 0x16b   : > { %v407_v48 = vrot.slane %v406_v47, 1 }
 0x16d   : > { %v408_v49 = vadd.f32 %v407_v48, %v406_v47 }
 0x16f   : > { %v409_v50 = vmul.f32 0.015625, %v408_v49 }
 0x171   : > { %v410_v51 = vsub.f32 %v366_v29, %v409_v50  ;;  %v411_v52 = vsub.f32 %v369_v30, %v409_v50  ;;  %v412_v53 = vsub.f32 %v374_v31, %v409_v50  ;;  %v413_v54 = vsub.f32 %v377_v33, %v409_v50 }
 0x172   : > { %v414_v55 = vsub.f32 %v382_v35, %v409_v50  ;;  %v415_v56 = vsub.f32 %v385_v38, %v409_v50  ;;  %v416_v57 = vsub.f32 %v390_v39, %v409_v50  ;;  %v417_v58 = vsub.f32 %v393_v41, %v409_v50 }
 0x173   : > { %v418_v59 = vmul.f32 %v410_v51, %v410_v51  ;;  %v419_v60 = vmul.f32 %v411_v52, %v411_v52  ;;  %v420_v61 = vmul.f32 %v412_v53, %v412_v53  ;;  %v421_v63 = vmul.f32 %v413_v54, %v413_v54 }
 0x174   : > { %v422_v1 = vmul.f32 %v414_v55, %v414_v55  ;;  %v423_v3 = vmul.f32 %v415_v56, %v415_v56  ;;  %v424_v5 = vmul.f32 %v416_v57, %v416_v57  ;;  %v425_v7 = vmul.f32 %v417_v58, %v417_v58 }
 0x175   : > { %v426_v62 = vadd.f32 %v419_v60, %v418_v59 }
 0x177   : > { %v427_v0 = vadd.f32 %v426_v62, %v420_v61 }
 0x179   : > { %v428_v2 = vadd.f32 %v427_v0, %v421_v63 }
 0x17b   : > { %v429_v4 = vadd.f32 %v428_v2, %v422_v1 }
 0x17d   : > { %v430_v6 = vadd.f32 %v429_v4, %v423_v3 }
 0x17f   : > { %v431_v8 = vadd.f32 %v430_v6, %v424_v5 }
 0x181   : > { %v432_v9 = vadd.f32 %v431_v8, %v425_v7 }
 0x183   : > { %v433_v10 = vrot.slane %v432_v9, 4 }
 0x185   : > { %v434_v11 = vadd.f32 %v433_v10, %v432_v9 }
 0x187   : > { %v435_v12 = vrot.slane %v434_v11, 2 }
 0x189   : > { %v436_v13 = vadd.f32 %v435_v12, %v434_v11 }
 0x18b   : > { %v437_v14 = vrot.slane %v436_v13, 1 }
 0x18d   : > { %v438_v15 = vadd.f32 %v437_v14, %v436_v13 }
 0x18f   : > { %v439_v16 = vmul.f32 0.015625, %v438_v15 }
 0x191   : > { %v440_v18 = vadd.f32 1e-05, %v439_v16 }
 0x193   : > { %791 = vrsqrt.f32 %v440_v18 }
 0x19d   : > { %v792_v22 = vpop.eup %791 }
 0x19e   : > { %v442_v23 = vmul.f32 %v792_v22, %v1102_v19 }
 0x1a0   : > { %v446_v25 = vrot.slane %v442_v23, %v445_v21 }
 0x1a2   : > { %v447_v26 = vmul.f32 %v446_v25, %v410_v51  ;;  %v448_v27 = vmul.f32 %v446_v25, %v411_v52  ;;  %v449_v28 = vmul.f32 %v446_v25, %v412_v53  ;;  %v450_v29 = vmul.f32 %v446_v25, %v413_v54 }
 0x1a3   : > { %v451_v30 = vmul.f32 %v446_v25, %v414_v55  ;;  %v452_v31 = vmul.f32 %v446_v25, %v415_v56  ;;  %v453_v32 = vmul.f32 %v446_v25, %v416_v57  ;;  %v454_v33 = vmul.f32 %v446_v25, %v417_v58 }
 0x1a4   : > { %v461_v34 = vadd.f32 %v458_v24, %v449_v28  ;;  %v462_v35 = vadd.f32 %v458_v24, %v450_v29  ;;  %v459_v36 = vadd.f32 %v458_v24, %v447_v26  ;;  %v460_v37 = vadd.f32 %v458_v24, %v448_v27 }
 0x1a5   : > { %v463_v38 = vadd.f32 %v458_v24, %v451_v30  ;;  %v464_v17 = vadd.f32 %v458_v24, %v452_v31  ;;  %v465_v39 = vadd.f32 %v458_v24, %v453_v32  ;;  %v466_v40 = vadd.f32 %v458_v24, %v454_v33 }
 0x1a6   : > { %v469_v19 = vmax.f32 %v461_v34, 0.0  ;;  %v470_v41 = vmax.f32 %v462_v35, 0.0  ;;  %v467_v42 = vmax.f32 %v459_v36, 0.0  ;;  %v468_v43 = vmax.f32 %v460_v37, 0.0 }
 0x1a7   : > { %v471_v44 = vmax.f32 %v463_v38, 0.0  ;;  %v472_v45 = vmax.f32 %v464_v17, 0.0  ;;  %v473_v46 = vmax.f32 %v465_v39, 0.0  ;;  %v474_v47 = vmax.f32 %v466_v40, 0.0 }
 0x1a8   : > { %v646_v48 = vpack.c.bf16 %v468_v43, %v467_v42  ;;  %v651_v49 = vpack.c.bf16 %v470_v41, %v469_v19 }
 0x1a9   : > { %v656_v50 = vpack.c.bf16 %v472_v45, %v471_v44  ;;  %v661_v51 = vpack.c.bf16 %v474_v47, %v473_v46 }
 0x1aa   : > { %647 = vst [vmem:[#allocation7] sm:$0xff] %v646_v48   ;;  %663 = vst [vmem:[#allocation7 + $0x8] sm:$0xff] %v651_v49  }
 0x1ab   : > { %664 = vst [vmem:[#allocation7 + $0x10] sm:$0xff] %v656_v50   ;;  %665 = vst [vmem:[#allocation7 + $0x18] sm:$0xff] %v661_v51  }
 0x1ac   : > { %864 = shalt.err (!%p861_p2)
}
 0x1ad   : > { %s865_s29 = scalar_lea.hbm %s1148_s3, 512 }
 0x1ae   : > { %p866_p11 = scmp.ne.s32.totalorder %s1148_s3, %s865_s29  ;;  %p871_p7 = scmp.lt.u32.totalorder %s865_s29, %s1148_s3 }
 0x1b0   : > { %p867_p13 = pnand %p866_p11, %p739_p4 }
 0x1b2   : > { %p868_p3 = pneg %p867_p13 }
 0x1b4   : > { %p873_p8 = pnand %p871_p7, %p868_p3 }
 0x1b6   : > { %876 = shalt.err (!%p873_p8)
}
 0x1b7   : > { %s926_s9 = smov 64   ;;  %s927_s11 = smov 4  }
 0x1b8   : > { %725 = dma.vmem_to_hbm [thread:$0]  (%p739_p4), %s522_s23, 512, %s1148_s3, [#allocation4], %s926_s9, %s926_s9, %s927_s11  }
 0x1b9   : > { %902 = dma.done.wait (%p739_p4), [#allocation4], 512  }
 0x1ba   : > { %904 = vsyncadd (%p739_p4), [#allocation4], 4294966784 }
 0x1bb PF: > { %p15_p1 = scmp.ge.s32.totalorder %s993_s22, 5   ;;  %s1161_s12 = smov %s911_s13 }
 0x1bc   : > { %s1162_s13 = smov %s915_s14  ;;  %s1163_s14 = smov %s1022_s10 }
 0x1bd   : > { %s1164_s15 = smov %s993_s22  ;;  %17 = sbr.rel (!%p15_p1) target bundleno = 5 (0x5), region = 81 }
 0x1c4   :  { %537 = vsyncpa [#allocation3], 1 }
 0x1c5   :  { %539 = vsyncpa [#allocation3 + $0x1], 1 }
 0x1c6   :  { %540 = vsyncpa [#allocation6], 1 }
 0x1c7   :  { %542 = vsyncpa [#allocation6 + $0x1], 1 }
 0x1c8   :  { %543 = vsyncpa [#allocation4], 1 }
 0x1c9   :  { %545 = vsyncpa [#allocation4 + $0x1], 1 }

</bundles_post_ra>
